<compile_context>
chip_gen: v6e
topology: v6e:2x2x1
jax: 0.10.0
libtpu: 0.0.40
codegen_flags: <defaults>
</compile_context>

<pallas_src>
import functools

import jax
import jax.numpy as jnp
import numpy as np
from jax.experimental import pallas as pl
from jax.experimental.pallas import tpu as pltpu


_LANES = 128
_SUBLANES = 8


def _round_up(x, m):
    return ((x + m - 1) // m) * m


def _vmem_capacity_bytes():
    try:
        return int(pltpu.get_tpu_info().vmem_capacity_bytes)
    except Exception:
        return 64 * 1024 * 1024  # conservative (v7x-sized) fallback


def _pick_tile_n(n, c, in_itemsize):
    """Largest batch tile that fits VMEM, capped for megacore load-balance."""
    budget = int(_vmem_capacity_bytes() * 0.6)
    # 3 inputs x 2 pipeline buffers at the input itemsize
    # + ~6 live (tile, C) f32 intermediates (p1, p2, q upcasts, logs, exp/kl)
    # + small per-row vectors.
    per_row = 3 * 2 * c * in_itemsize + 6 * c * 4 + 64
    tile = budget // max(per_row, 1)
    tile = (tile // _SUBLANES) * _SUBLANES
    tile = max(_SUBLANES, min(512, tile))
    # keep >= ~4 tiles so the "parallel" grid axis can shard across 2 TCs
    # on v7x (costs nothing on v5e/v6e).
    target = max(_SUBLANES, _round_up(-(-n // 4), _SUBLANES))
    tile = min(tile, target)
    return min(tile, _round_up(n, _SUBLANES))


def _loss_kernel(p1_ref, p2_ref, q_ref, y_ref, out_ref, *,
                 a1, a2, n_valid, mask_rows, exp_dtype):
    tid = pl.program_id(0)
    q = q_ref[...].astype(jnp.float32)            # [T, C]
    y = y_ref[...]                                # [T, 1] int32
    t, c = q.shape

    lane = jax.lax.broadcasted_iota(jnp.int32, (t, c), 1)

    def ce_rows(logits):
        # per-row (logsumexp(logits) - logits[y]); matches nn.CrossEntropyLoss
        m = jnp.max(logits, axis=-1, keepdims=True)
        ex = jnp.exp((logits - m).astype(exp_dtype)).astype(jnp.float32)
        lse = m + jnp.log(jnp.sum(ex, axis=-1, keepdims=True))
        picked = jnp.sum(jnp.where(lane == y, logits, 0.0),
                         axis=-1, keepdims=True)
        return lse - picked

    w1 = 1.0 - a1
    w2 = 1.0 - a2

    p1 = p1_ref[...].astype(jnp.float32)
    p2 = p2_ref[...].astype(jnp.float32)

    # Fused KL elementwise term (single lane reduction):
    #   (w1+w2)*xlogy(q,q) - w1*q*log(p1) - w2*q*log(p2)
    # NOTE: q==0 with p==0 gives 0*(-inf)=NaN in the cross term, matching
    # torch.nn.functional.kl_div for such inputs (softmax inputs never hit it).
    xlogy_q = jnp.where(q > 0.0, q * jnp.log(q), 0.0)
    kl_elem = ((w1 + w2) * xlogy_q
               - w1 * (q * jnp.log(p1))
               - w2 * (q * jnp.log(p2)))
    kl_row = jnp.sum(kl_elem, axis=-1, keepdims=True)

    per_row = (a1 * ce_rows(p1) + a2 * ce_rows(p2) + ce_rows(q) + kl_row)

    if mask_rows:
        # Only built when N is not tile-aligned.  jnp.where is a select, so
        # NaN/Inf garbage from out-of-bounds rows is discarded, not multiplied.
        row = jax.lax.broadcasted_iota(jnp.int32, (t, 1), 0)
        per_row = jnp.where((tid * t + row) < n_valid, per_row, 0.0)

    partial = jnp.sum(per_row)        # un-normalized; wrapper divides by N

    # lane-dense partial-loss block for this tile
    out_ref[...] = jnp.full((1, _LANES), partial, dtype=jnp.float32)


def pallas_loss(p1, p2, q, y, a1, a2, tile_n=None):
    n, c = p1.shape
    itemsize = jnp.dtype(p1.dtype).itemsize
    if tile_n is None:
        tile_n = _pick_tile_n(n, c, itemsize)
    else:
        tile_n = max(_SUBLANES, (int(tile_n) // _SUBLANES) * _SUBLANES)
    num_tiles = -(-n // tile_n)
    mask_rows = (n % tile_n) != 0

    y2 = y.astype(jnp.int32).reshape(n, 1)

    # bf16 inputs -> bf16 stabilized exp (EUP runs bf16 ~2x on v6e/v7x);
    # sums and accumulators stay f32.  f32 inputs keep the f32 path.
    bf16 = jnp.bfloat16
    exp_dtype = bf16 if (p1.dtype == bf16 and p2.dtype == bf16
                         and q.dtype == bf16) else jnp.float32

    kernel = functools.partial(
        _loss_kernel, a1=float(a1), a2=float(a2),
        n_valid=n, mask_rows=mask_rows, exp_dtype=exp_dtype)

    cost = pl.CostEstimate(
        flops=int(30 * n * c),
        transcendentals=int(6 * n * c),
        bytes_accessed=int(3 * n * c * itemsize + 4 * n
                           + 4 * num_tiles * _LANES),
    )

    vmem_cap = _vmem_capacity_bytes()
    compiler_params = pltpu.CompilerParams(
        dimension_semantics=("parallel",),
        vmem_limit_bytes=int(min(vmem_cap * 3 // 4, 100 * 1024 * 1024)),
    )

    out = pl.pallas_call(
        kernel,
        out_shape=jax.ShapeDtypeStruct((1, num_tiles * _LANES), jnp.float32),
        grid_spec=pltpu.PrefetchScalarGridSpec(
            num_scalar_prefetch=0,
            grid=(num_tiles,),
            in_specs=[
                pl.BlockSpec((tile_n, c), lambda i: (i, 0)),
                pl.BlockSpec((tile_n, c), lambda i: (i, 0)),
                pl.BlockSpec((tile_n, c), lambda i: (i, 0)),
                pl.BlockSpec((tile_n, 1), lambda i: (i, 0)),
            ],
            out_specs=pl.BlockSpec((1, _LANES), lambda i: (0, i)),
        ),
        compiler_params=compiler_params,
        cost_estimate=cost,
    )(p1, p2, q, y2)

    partials = out.reshape(num_tiles, _LANES)[:, 0]
    return jnp.sum(partials) / np.float32(n)


def _reference_loss(p1, p2, q, y, a1, a2):
    # Pure-JAX reference mirroring the PyTorch module's semantics.
    def ce(logits):
        lse = jax.nn.logsumexp(logits, axis=-1)
        picked = jnp.take_along_axis(logits, y[:, None], axis=-1)[:, 0]
        return jnp.mean(lse - picked)

    def kd(log_input, target):
        xlogy = jnp.where(target > 0.0, target * jnp.log(target), 0.0)
        return jnp.sum(xlogy - target * log_input) / target.shape[0]

    return (a1 * ce(p1) + (1.0 - a1) * kd(jnp.log(p1), q) +
            a2 * ce(p2) + (1.0 - a2) * kd(jnp.log(p2), q) + ce(q))


def _make_case(key, n, c):
    k1, k2, k3, k4 = jax.random.split(key, 4)
    p1 = jax.nn.softmax(jax.random.normal(k1, (n, c), jnp.float32), axis=-1)
    p2 = jax.nn.softmax(jax.random.normal(k2, (n, c), jnp.float32), axis=-1)
    q = jax.nn.softmax(jax.random.normal(k3, (n, c), jnp.float32), axis=-1)
    y = jax.random.randint(k4, (n,), 0, c, dtype=jnp.int32)
    return p1, p2, q, y


if __name__ == "__main__":
    a1, a2 = 0.7, 0.4
    key = jax.random.PRNGKey(0)
    key1, key2 = jax.random.split(key, 2)

    # Case 1: N=8, C=32 (single tile, C handled without any padding)
    p1, p2, q, y = _make_case(key1, 8, 32)
    loss = pallas_loss(p1, p2, q, y, a1, a2)
    jax.block_until_ready(loss)
    ref = _reference_loss(p1, p2, q, y, a1, a2)
    np.testing.assert_allclose(np.asarray(loss), np.asarray(ref),
                               rtol=1e-5, atol=1e-5)

    # Case 2: ragged batch + multiple tiles (N=20, tile_n=8 -> 3 tiles,
    # last tile row-masked in-kernel) to exercise the grid / masking paths.
    p1b, p2b, qb, yb = _make_case(key2, 20, 32)
    loss2 = pallas_loss(p1b, p2b, qb, yb, a1, a2, tile_n=8)
    jax.block_until_ready(loss2)
    ref2 = _reference_loss(p1b, p2b, qb, yb, a1, a2)
    np.testing.assert_allclose(np.asarray(loss2), np.asarray(ref2),
                               rtol=1e-5, atol=1e-5)

    print("KERNEL_OK")
</pallas_src>

<mosaic_0001>
module attributes {stable_mosaic.version = 11 : i64} {
  func.func @_loss_kernel(%arg0: i32, %arg1: memref<8x32xf32, #tpu.memory_space<vmem>>, %arg2: memref<8x32xf32, #tpu.memory_space<vmem>>, %arg3: memref<8x32xf32, #tpu.memory_space<vmem>>, %arg4: memref<8x1xi32, #tpu.memory_space<vmem>>, %arg5: memref<1x128xf32, #tpu.memory_space<vmem>>) attributes {dimension_semantics = [#tpu.dimension_semantics<parallel>], iteration_bounds = array<i64: 1>, scalar_prefetch = 0 : i64, scratch_operands = 0 : i64, tpu.core_type = #tpu.core_type<tc>, window_params = [{transform_indices = @transform_0, window_bounds = array<i64: 8, 32>}, {transform_indices = @transform_1, window_bounds = array<i64: 8, 32>}, {transform_indices = @transform_2, window_bounds = array<i64: 8, 32>}, {transform_indices = @transform_3, window_bounds = array<i64: 8, 1>}, {transform_indices = @transform_4, window_bounds = array<i64: 1, 128>}]} {
    %c0 = arith.constant 0 : index
    %c0_0 = arith.constant 0 : index
    %0 = vector.load %arg3[%c0, %c0_0] : memref<8x32xf32, #tpu.memory_space<vmem>>, vector<8x32xf32>
    %c0_1 = arith.constant 0 : index
    %c0_2 = arith.constant 0 : index
    %1 = vector.load %arg4[%c0_1, %c0_2] : memref<8x1xi32, #tpu.memory_space<vmem>>, vector<8x1xi32>
    %2 = tpu.iota {dimensions = array<i32: 1>} : vector<8x32xi32>
    %c0_3 = arith.constant 0 : index
    %c0_4 = arith.constant 0 : index
    %3 = vector.load %arg1[%c0_3, %c0_4] : memref<8x32xf32, #tpu.memory_space<vmem>>, vector<8x32xf32>
    %c0_5 = arith.constant 0 : index
    %c0_6 = arith.constant 0 : index
    %4 = vector.load %arg2[%c0_5, %c0_6] : memref<8x32xf32, #tpu.memory_space<vmem>>, vector<8x32xf32>
    %cst = arith.constant 0.000000e+00 : f32
    %5 = vector.broadcast %cst : f32 to vector<8x32xf32>
    %6 = arith.cmpf ogt, %0, %5 : vector<8x32xf32>
    %7 = math.log %0 : vector<8x32xf32>
    %8 = arith.mulf %0, %7 : vector<8x32xf32>
    %cst_7 = arith.constant 0.000000e+00 : f32
    %9 = vector.broadcast %cst_7 : f32 to vector<8x32xf32>
    %10 = arith.select %6, %8, %9 : vector<8x32xi1>, vector<8x32xf32>
    %cst_8 = arith.constant 0.899999976 : f32
    %11 = vector.broadcast %cst_8 : f32 to vector<8x32xf32>
    %12 = arith.mulf %11, %10 : vector<8x32xf32>
    %13 = math.log %3 : vector<8x32xf32>
    %14 = arith.mulf %0, %13 : vector<8x32xf32>
    %cst_9 = arith.constant 3.000000e-01 : f32
    %15 = vector.broadcast %cst_9 : f32 to vector<8x32xf32>
    %16 = arith.mulf %15, %14 : vector<8x32xf32>
    %17 = arith.subf %12, %16 : vector<8x32xf32>
    %18 = math.log %4 : vector<8x32xf32>
    %19 = arith.mulf %0, %18 : vector<8x32xf32>
    %cst_10 = arith.constant 6.000000e-01 : f32
    %20 = vector.broadcast %cst_10 : f32 to vector<8x32xf32>
    %21 = arith.mulf %20, %19 : vector<8x32xf32>
    %22 = arith.subf %17, %21 : vector<8x32xf32>
    %cst_11 = arith.constant dense<0.000000e+00> : vector<8xf32>
    %23 = vector.multi_reduction <add>, %22, %cst_11 [1] : vector<8x32xf32> to vector<8xf32>
    %24 = vector.shape_cast %23 : vector<8xf32> to vector<8x1xf32>
    %cst_12 = arith.constant dense<0xFF800000> : vector<8xf32>
    %25 = vector.multi_reduction <maximumf>, %3, %cst_12 [1] : vector<8x32xf32> to vector<8xf32>
    %26 = vector.shape_cast %25 : vector<8xf32> to vector<8x1xf32>
    %27 = vector.broadcast %26 : vector<8x1xf32> to vector<8x32xf32>
    %28 = arith.subf %3, %27 : vector<8x32xf32>
    %29 = math.exp %28 : vector<8x32xf32>
    %cst_13 = arith.constant dense<0.000000e+00> : vector<8xf32>
    %30 = vector.multi_reduction <add>, %29, %cst_13 [1] : vector<8x32xf32> to vector<8xf32>
    %31 = vector.shape_cast %30 : vector<8xf32> to vector<8x1xf32>
    %32 = math.log %31 : vector<8x1xf32>
    %33 = arith.addf %26, %32 : vector<8x1xf32>
    %34 = vector.broadcast %1 : vector<8x1xi32> to vector<8x32xi32>
    %35 = arith.cmpi eq, %2, %34 : vector<8x32xi32>
    %cst_14 = arith.constant 0.000000e+00 : f32
    %36 = vector.broadcast %cst_14 : f32 to vector<8x32xf32>
    %37 = arith.select %35, %3, %36 : vector<8x32xi1>, vector<8x32xf32>
    %cst_15 = arith.constant dense<0.000000e+00> : vector<8xf32>
    %38 = vector.multi_reduction <add>, %37, %cst_15 [1] : vector<8x32xf32> to vector<8xf32>
    %39 = vector.shape_cast %38 : vector<8xf32> to vector<8x1xf32>
    %40 = arith.subf %33, %39 : vector<8x1xf32>
    %cst_16 = arith.constant 0.699999988 : f32
    %41 = vector.broadcast %cst_16 : f32 to vector<8x1xf32>
    %42 = arith.mulf %41, %40 : vector<8x1xf32>
    %cst_17 = arith.constant dense<0xFF800000> : vector<8xf32>
    %43 = vector.multi_reduction <maximumf>, %4, %cst_17 [1] : vector<8x32xf32> to vector<8xf32>
    %44 = vector.shape_cast %43 : vector<8xf32> to vector<8x1xf32>
    %45 = vector.broadcast %44 : vector<8x1xf32> to vector<8x32xf32>
    %46 = arith.subf %4, %45 : vector<8x32xf32>
    %47 = math.exp %46 : vector<8x32xf32>
    %cst_18 = arith.constant dense<0.000000e+00> : vector<8xf32>
    %48 = vector.multi_reduction <add>, %47, %cst_18 [1] : vector<8x32xf32> to vector<8xf32>
    %49 = vector.shape_cast %48 : vector<8xf32> to vector<8x1xf32>
    %50 = math.log %49 : vector<8x1xf32>
    %51 = arith.addf %44, %50 : vector<8x1xf32>
    %52 = vector.broadcast %1 : vector<8x1xi32> to vector<8x32xi32>
    %53 = arith.cmpi eq, %2, %52 : vector<8x32xi32>
    %cst_19 = arith.constant 0.000000e+00 : f32
    %54 = vector.broadcast %cst_19 : f32 to vector<8x32xf32>
    %55 = arith.select %53, %4, %54 : vector<8x32xi1>, vector<8x32xf32>
    %cst_20 = arith.constant dense<0.000000e+00> : vector<8xf32>
    %56 = vector.multi_reduction <add>, %55, %cst_20 [1] : vector<8x32xf32> to vector<8xf32>
    %57 = vector.shape_cast %56 : vector<8xf32> to vector<8x1xf32>
    %58 = arith.subf %51, %57 : vector<8x1xf32>
    %cst_21 = arith.constant 4.000000e-01 : f32
    %59 = vector.broadcast %cst_21 : f32 to vector<8x1xf32>
    %60 = arith.mulf %59, %58 : vector<8x1xf32>
    %61 = arith.addf %42, %60 : vector<8x1xf32>
    %cst_22 = arith.constant dense<0xFF800000> : vector<8xf32>
    %62 = vector.multi_reduction <maximumf>, %0, %cst_22 [1] : vector<8x32xf32> to vector<8xf32>
    %63 = vector.shape_cast %62 : vector<8xf32> to vector<8x1xf32>
    %64 = vector.broadcast %63 : vector<8x1xf32> to vector<8x32xf32>
    %65 = arith.subf %0, %64 : vector<8x32xf32>
    %66 = math.exp %65 : vector<8x32xf32>
    %cst_23 = arith.constant dense<0.000000e+00> : vector<8xf32>
    %67 = vector.multi_reduction <add>, %66, %cst_23 [1] : vector<8x32xf32> to vector<8xf32>
    %68 = vector.shape_cast %67 : vector<8xf32> to vector<8x1xf32>
    %69 = math.log %68 : vector<8x1xf32>
    %70 = arith.addf %63, %69 : vector<8x1xf32>
    %71 = vector.broadcast %1 : vector<8x1xi32> to vector<8x32xi32>
    %72 = arith.cmpi eq, %2, %71 : vector<8x32xi32>
    %cst_24 = arith.constant 0.000000e+00 : f32
    %73 = vector.broadcast %cst_24 : f32 to vector<8x32xf32>
    %74 = arith.select %72, %0, %73 : vector<8x32xi1>, vector<8x32xf32>
    %cst_25 = arith.constant dense<0.000000e+00> : vector<8xf32>
    %75 = vector.multi_reduction <add>, %74, %cst_25 [1] : vector<8x32xf32> to vector<8xf32>
    %76 = vector.shape_cast %75 : vector<8xf32> to vector<8x1xf32>
    %77 = arith.subf %70, %76 : vector<8x1xf32>
    %78 = arith.addf %61, %77 : vector<8x1xf32>
    %79 = arith.addf %78, %24 : vector<8x1xf32>
    %80 = vector.shape_cast %79 : vector<8x1xf32> to vector<1x8x1xf32>
    %cst_26 = arith.constant dense<0.000000e+00> : vector<1xf32>
    %81 = vector.multi_reduction <add>, %80, %cst_26 [1, 2] : vector<1x8x1xf32> to vector<1xf32>
    %82 = vector.shape_cast %81 : vector<1xf32> to vector<1x1x1xf32>
    %83 = vector.extract %82[0, 0, 0] : f32 from vector<1x1x1xf32>
    %84 = vector.broadcast %83 : f32 to vector<1x128xf32>
    %c0_27 = arith.constant 0 : index
    %c0_28 = arith.constant 0 : index
    %85 = vector.load %arg5[%c0_27, %c0_28] : memref<1x128xf32, #tpu.memory_space<vmem>>, vector<1x128xf32>
    tpu.vector_store %arg5[%c0_27, %c0_28], %84 {strides = array<i32>} : memref<1x128xf32, #tpu.memory_space<vmem>>, vector<1x128xf32>,
    return
  }
  func.func @transform_0(%arg0: i32) -> (i32, i32) {
    %c0_i32 = arith.constant 0 : i32
    %c0_i32_0 = arith.constant 0 : i32
    return %arg0, %c0_i32 : i32, i32
  }
  func.func @transform_1(%arg0: i32) -> (i32, i32) {
    %c0_i32 = arith.constant 0 : i32
    %c0_i32_0 = arith.constant 0 : i32
    return %arg0, %c0_i32 : i32, i32
  }
  func.func @transform_2(%arg0: i32) -> (i32, i32) {
    %c0_i32 = arith.constant 0 : i32
    %c0_i32_0 = arith.constant 0 : i32
    return %arg0, %c0_i32 : i32, i32
  }
  func.func @transform_3(%arg0: i32) -> (i32, i32) {
    %c0_i32 = arith.constant 0 : i32
    %c0_i32_0 = arith.constant 0 : i32
    return %arg0, %c0_i32 : i32, i32
  }
  func.func @transform_4(%arg0: i32) -> (i32, i32) {
    %c0_i32 = arith.constant 0 : i32
    %c0_i32_0 = arith.constant 0 : i32
    return %c0_i32, %arg0 : i32, i32
  }
}

</mosaic_0001>

<bundles_post_ra>
// kernel: tpu_custom_call.1
= control target key start
LH: loop header
LB: loop body
LE: loop exit
PB: predicated region body
PF: predicated region fallthrough
CT: control target
= control target key end

     0   :  { %9 = vsyncpa [#allocation3], 0  ;;  %s310_s0 = inlined_call_operand.vmem [shape: f32[8,32], index: 0, kind: input, shape index: {}]   ;;  %s311_s1 = inlined_call_operand.hbm [shape: f32[8,32], index: 1, kind: input, shape index: {}]   ;;  %s312_s2 = inlined_call_operand.hbm [shape: f32[8,32], index: 2, kind: input, shape index: {}]   ;;  %s313_s3 = inlined_call_operand.vmem [shape: s32[8,1], index: 3, kind: input, shape index: {}]   ;;  %s314_s4 = inlined_call_operand.hbm [shape: f32[1,128], index: 4, kind: output, shape index: {}]  }
   0x1   :  { %10 = vsyncpa [#allocation6], 0 }
   0x2   :  { %11 = vsyncpa [#allocation4], 0  ;;  %s249_s15 = smov [#allocation2]   ;;  %s250_s17 = smov [#allocation5]  }
   0x3   :  { %s20_s16 = sshll.u32 %s249_s15, 4  ;;  %s30_s18 = sshll.u32 %s250_s17, 4  ;;  %s21_s16 = int_to_ptr.vmem [resolvable:$true] %s20_s16  ;;  %s31_s18 = int_to_ptr.vmem [resolvable:$true] %s30_s18 }
   0x4   :  { %s191_s19 = scalar_lea.vmem %s21_s16, 128  ;;  %p196_p1 = scmp.lt.s32.totalorder %s21_s16, %s21_s16 }
   0x5   :  { %p192_p0 = scmp.ne.s32.totalorder %s21_s16, %s191_s19  ;;  %p197_p2 = scmp.lt.s32.totalorder %s191_s19, %s191_s19 }
   0x7   :  { %p198_p3 = por %p197_p2, %p196_p1 }
   0x9   :  { %p199_p4 = pnand %p198_p3, %p192_p0 }
   0xb   :  { %202 = shalt.err (!%p199_p4)
}
   0xc   :  { %23 = dma.hbm_to_vmem [thread:$0]  %s311_s1, 128, %s21_s16, [#allocation3]  }
   0xd   :  { %s211_s22 = scalar_lea.vmem %s31_s18, 128  ;;  %p216_p6 = scmp.lt.s32.totalorder %s31_s18, %s31_s18 }
   0xe   :  { %p212_p5 = scmp.ne.s32.totalorder %s31_s18, %s211_s22  ;;  %p217_p7 = scmp.lt.s32.totalorder %s211_s22, %s211_s22 }
  0x10   :  { %p218_p8 = por %p217_p7, %p216_p6 }
  0x12   :  { %p219_p9 = pnand %p218_p8, %p212_p5 }
  0x14   :  { %222 = shalt.err (!%p219_p9)
}
  0x15   :  { %33 = dma.hbm_to_vmem [thread:$0]  %s312_s2, 128, %s31_s18, [#allocation6]  }
  0x16   :  { %243 = dma.done.wait [#allocation3], 128  }
  0x17   :  { %244 = vsyncadd [#allocation3], 4294967168 }
  0x18   :  { %245 = dma.done.wait [#allocation6], 128  }
  0x19   :  { %246 = vsyncadd [#allocation6], 4294967168  ;;  %v251_v0 = vmov 0   ;;  %vm64_vm0 = vcmask 261120   ;;  %v46_v1 = vld [vmem:[%s310_s0] sm:$0xff]  ;;  %v42_v3 = vld [vmem:[#allocation5] sm:$0xff]  ;;  %v44_v8 = vlaneseq }
  0x1a   :  { %163 = vset.pattern.permute.xlu1 %v251_v0  ;;  %164 = vset.pattern.permute.xlu0 %v251_v0  ;;  %v47_v2 = vld [vmem:[#allocation2] sm:$0xff]  ;;  %v68_v4 = vsel %vm64_vm0, %v46_v1, -inf  ;;  %v109_v5 = vsel %vm64_vm0, %v42_v3, -inf  ;;  %165 = vlog2.f32 %v42_v3  ;;  %vm48_vm2 = vcmp.gt.f32.partialorder %v42_v3, 0.0  ;;  %s252_s0 = smov [#allocation7]  }
  0x1b   :  { %69 = vmax.xlane.f32.xlu0 %v68_v4  ;;  %110 = vmax.xlane.f32.xlu1 %v109_v5  ;;  %v90_v6 = vsel %vm64_vm0, %v47_v2, -inf  ;;  %v43_v7 = vld [vmem:[%s313_s3] sm:$0xff]  ;;  %167 = vlog2.f32 %v46_v1  ;;  %v45_v13 = vand.u32 127, %v44_v8  ;;  %vm128_vm3 = vcmask 7168   ;;  %s147_s3 = sshll.u32 %s252_s0, 4  ;;  %s148_s3 = int_to_ptr.vmem [resolvable:$true] %s147_s3 }
  0x1c   :  { %169 = vlog2.f32 %v47_v2  ;;  %s223_s28 = scalar_lea.vmem %s148_s3, 16  ;;  %s227_s29 = scalar_lea.vmem %s148_s3, 32 }
  0x1d   :  { %p224_p10 = scmp.ne.s32.totalorder %s148_s3, %s223_s28  ;;  %p228_p11 = scmp.lt.s32.totalorder %s148_s3, %s148_s3 }
  0x1e   :  { %p229_p12 = scmp.lt.s32.totalorder %s227_s29, %s223_s28 }
  0x1f   :  { %91 = vmax.xlane.f32.xlu0 %v90_v6 }
  0x20   :  { %p230_p13 = por %p229_p12, %p228_p11 }
  0x22   :  { %p231_p0 = pnand %p230_p13, %p224_p10 }
  0x27   :  { %v166_v22 = vpop.eup %165 }
  0x28   :  { %v168_v23 = vpop.eup %167  ;;  %v50_v24 = vmul.f32 0.6931472, %v166_v22 }
  0x29   :  { %v170_v25 = vpop.eup %169  ;;  %v55_v26 = vmul.f32 0.6931472, %v168_v23 }
  0x2a   :  { %v51_v28 = vmul.f32 %v50_v24, %v42_v3  ;;  %v60_v32 = vmul.f32 0.6931472, %v170_v25 }
  0x2b   :  { %v56_v31 = vmul.f32 %v55_v26, %v42_v3 }
  0x2c   :  { %81 = vperm.xlu1 %163, %v43_v7   ;;  %v52_v34 = vsel %vm48_vm2, %v51_v28, 0.0  ;;  %v61_v39 = vmul.f32 %v60_v32, %v42_v3 }
  0x2d   :  { %v53_v37 = vmul.f32 0.9, %v52_v34  ;;  %v57_v38 = vmul.f32 0.3, %v56_v31 }
  0x2e   :  { %v62_v43 = vmul.f32 0.6, %v61_v39 }
  0x2f   :  { %v58_v42 = vsub.f32 %v53_v37, %v57_v38 }
  0x31   :  { %v63_v46 = vsub.f32 %v58_v42, %v62_v43 }
  0x33   :  { %v65_v47 = vsel %vm64_vm0, %v63_v46, 0.0 }
  0xa4   :  { %v70_v9 = vpop.xlane.xlu0 %69  ;;  %v293_v10 = vpop.xlane.xlu1 %110 }
  0xa5   :  { %v71_v11 = vsub.f32 %v46_v1, %v70_v9  ;;  %v112_v12 = vsub.f32 %v42_v3, %v293_v10 }
  0xa7   :  { %v72_v14 = vmul.f32 1.442695, %v71_v11  ;;  %v113_v16 = vmul.f32 1.442695, %v112_v12 }
  0xa8   :  { %v92_v15 = vpop.xlane.xlu0 %91  ;;  %v82_v17 = vpop.permute.xlu1 %81 }
  0xa9   :  { %171 = vpow2.f32 %v72_v14  ;;  %v93_v18 = vsub.f32 %v47_v2, %v92_v15  ;;  %vm83_vm1 = vcmp.eq.s32.totalorder %v45_v13, %v82_v17 }
  0xaa   :  { %v102_v19 = vsel %vm83_vm1, %v47_v2, 0.0  ;;  %173 = vpow2.f32 %v113_v16  ;;  %v84_v40 = vsel %vm83_vm1, %v46_v1, 0.0  ;;  %v121_v44 = vsel %vm83_vm1, %v42_v3, 0.0 }
  0xab   :  { %v94_v20 = vmul.f32 1.442695, %v93_v18  ;;  %v103_v21 = vsel %vm64_vm0, %v102_v19, 0.0  ;;  %v85_v41 = vsel %vm64_vm0, %v84_v40, 0.0  ;;  %v122_v45 = vsel %vm64_vm0, %v121_v44, 0.0 }
  0xac   :  { %104 = vadd.xlane.f32.xlu1 %v103_v21 }
  0xad   :  { %175 = vpow2.f32 %v94_v20 }
  0xb6   :  { %v172_v27 = vpop.eup %171 }
  0xb7   :  { %v74_v29 = vsel %vm64_vm0, %v172_v27, 0.0  ;;  %v174_v30 = vpop.eup %173 }
  0xb8   :  { %75 = vadd.xlane.f32.xlu0 %v74_v29  ;;  %v115_v36 = vsel %vm64_vm0, %v174_v30, 0.0 }
  0xba   :  { %v176_v33 = vpop.eup %175 }
  0xbb   :  { %v96_v35 = vsel %vm64_vm0, %v176_v33, 0.0 }
  0xbc   :  { %97 = vadd.xlane.f32.xlu0 %v96_v35 }
  0xc0   :  { %116 = vadd.xlane.f32.xlu0 %v115_v36 }
  0xc4   :  { %86 = vadd.xlane.f32.xlu0 %v85_v41 }
  0xc8   :  { %123 = vadd.xlane.f32.xlu0 %v122_v45 }
  0xcc   :  { %66 = vadd.xlane.f32.xlu0 %v65_v47 }
 0x135   :  { %v105_v57 = vpop.xlane.xlu1 %104 }
 0x141   :  { %v76_v48 = vpop.xlane.xlu0 %75 }
 0x142   :  { %177 = vlog2.f32 %v76_v48 }
 0x145   :  { %v98_v49 = vpop.xlane.xlu0 %97 }
 0x146   :  { %179 = vlog2.f32 %v98_v49 }
 0x149   :  { %v117_v50 = vpop.xlane.xlu0 %116 }
 0x14a   :  { %181 = vlog2.f32 %v117_v50 }
 0x14d   :  { %v87_v55 = vpop.xlane.xlu0 %86 }
 0x14f   :  { %v178_v51 = vpop.eup %177 }
 0x150   :  { %v78_v52 = vmul.f32 0.6931472, %v178_v51 }
 0x151   :  { %v124_v63 = vpop.xlane.xlu0 %123 }
 0x152   :  { %v79_v53 = vadd.f32 %v78_v52, %v70_v9 }
 0x153   :  { %v180_v54 = vpop.eup %179 }
 0x154   :  { %v100_v56 = vmul.f32 0.6931472, %v180_v54  ;;  %v88_v58 = vsub.f32 %v79_v53, %v87_v55 }
 0x155   :  { %v67_v5 = vpop.xlane.xlu0 %66 }
 0x156   :  { %v101_v59 = vadd.f32 %v100_v56, %v92_v15  ;;  %v89_v0 = vmul.f32 0.7, %v88_v58 }
 0x157   :  { %v182_v60 = vpop.eup %181 }
 0x158   :  { %v119_v61 = vmul.f32 0.6931472, %v182_v60  ;;  %v106_v62 = vsub.f32 %v101_v59, %v105_v57 }
 0x15a   :  { %v107_v1 = vmul.f32 0.4, %v106_v62  ;;  %v120_v2 = vadd.f32 %v119_v61, %v293_v10 }
 0x15c   :  { %v108_v3 = vadd.f32 %v107_v1, %v89_v0  ;;  %v125_v4 = vsub.f32 %v120_v2, %v124_v63 }
 0x15e   :  { %v126_v6 = vadd.f32 %v125_v4, %v108_v3 }
 0x160   :  { %v127_v7 = vadd.f32 %v126_v6, %v67_v5 }
 0x162   :  { %v129_v8 = vsel %vm128_vm3, %v127_v7, 0.0 }
 0x163   :  { %130 = vadd.xlane.f32.xlu0 %v129_v8 }
 0x1ec   :  { %v131_v9 = vpop.xlane.xlu0 %130 }
 0x1ed   :  { %v132_v11 = vrot.slane %v131_v9, 4 }
 0x1ef   :  { %v133_v12 = vadd.f32 %v132_v11, %v131_v9 }
 0x1f1   :  { %v134_v13 = vrot.slane %v133_v12, 2 }
 0x1f3   :  { %v135_v14 = vadd.f32 %v134_v13, %v133_v12 }
 0x1f5   :  { %v136_v15 = vrot.slane %v135_v14, 1 }
 0x1f7   :  { %v137_v16 = vadd.f32 %v136_v15, %v135_v14 }
 0x1f9   :  { %157 = vpush %v137_v16 }
 0x22a   :  { %s158_s27 = spop %157 }
 0x22b   :  { %v139_v10 = vstv %s158_s27 }
 0x22c   :  { %140 = vst [vmem:[#allocation7] sm:$0x1] %v139_v10 }
 0x22d   :  { %234 = shalt.err (!%p231_p0)
}
 0x22e   :  { %150 = dma.vmem_to_hbm [thread:$0]  %s148_s3, 16, %s314_s4, [#allocation4]  }
 0x22f   :  { %247 = dma.done.wait [#allocation4], 16  }
 0x230   :  { %248 = vsyncadd [#allocation4], 4294967280 }
 0x231   :  { %154 = vsyncpa [#allocation3], 1 }
 0x232   :  { %155 = vsyncpa [#allocation6], 1 }
 0x233   :  { %156 = vsyncpa [#allocation4], 1 }

</bundles_post_ra>
